<compile_context>
chip_gen: v7x
topology: tpu7x:2x2x1
jax: 0.10.0
libtpu: 0.0.40
codegen_flags: <defaults>
</compile_context>

<pallas_src>
import functools

import jax
import jax.numpy as jnp
from jax import lax
from jax.experimental import pallas as pl
from jax.experimental.pallas import tpu as pltpu

_LANES = 128
_TARGET_BLOCK_BYTES = 1 << 20  # ~1 MiB per input block


def _round_up(x: int, m: int) -> int:
    return (x + m - 1) // m * m


def _sublane_multiple(dtype) -> int:
    # f32 -> 8, bf16/f16 -> 16, int8/fp8/bool -> 32 (packed sublanes).
    return max(8, 32 // jnp.dtype(dtype).itemsize)


def _celoss_kernel(x_ref, y_ref, out_ref, *, tile_rows, n_valid, need_mask):
    # x_ref  : (tile_rows, 128) logits (native dtype) in VMEM
    # y_ref  : (tile_rows, 128) labels (native dtype) in VMEM
    # out_ref: (8, 128) f32 per-tile partial sum in VMEM
    x = x_ref[...].astype(jnp.float32)
    y = y_ref[...].astype(jnp.float32)

    # Stable BCE-with-logits: max(x,0) - x*y + log1p(exp(-|x|))
    #   == -( y*log(sigmoid(x)) + (1-y)*log(1-sigmoid(x)) )
    bce = jnp.maximum(x, 0.0) - x * y + jnp.log1p(jnp.exp(-jnp.abs(x)))

    if need_mask:
        # Zero out padded / out-of-bounds elements (flat index >= true B).
        # jnp.where also stops NaN/Inf propagation from OOB garbage rows.
        pid = pl.program_id(0)
        rows = lax.broadcasted_iota(jnp.int32, bce.shape, 0) + pid * tile_rows
        lanes = lax.broadcasted_iota(jnp.int32, bce.shape, 1)
        valid = rows * _LANES + lanes < n_valid
        bce = jnp.where(valid, bce, 0.0)

    # Sublane-wise VALU reduction; final cross-lane reduce happens in wrapper.
    out_ref[...] = bce.reshape(tile_rows // 8, 8, _LANES).sum(axis=0)


def _celoss_jnp(output, labels):
    x = output[:, 0].astype(jnp.float32).reshape(-1)
    y = labels.astype(jnp.float32).reshape(-1)
    bce = jnp.maximum(x, 0.0) - x * y + jnp.log1p(jnp.exp(-jnp.abs(x)))
    return jnp.mean(bce)


def celoss(output, labels, *, min_pallas_batch=512):
    """JAX/Pallas equivalent of CELoss.forward. Returns (fpcls, fpcls)."""
    B = output.shape[0]
    assert labels.shape[0] == B

    # Fixed pallas_call overhead dwarfs the work for tiny batches.
    if B < min_pallas_batch:
        fpcls = _celoss_jnp(output, labels)
        return fpcls, fpcls

    # Only output[:, :1] is ever used: slice it here so the kernel streams B
    # values instead of B*C.  Keep native dtypes (cast to f32 inside kernel).
    x = output[:, 0].reshape(B)
    y = labels.reshape(B)

    # Lane-dense layout: pad only up to a multiple of 128 (no-op if aligned).
    rows = pl.cdiv(B, _LANES)
    pad = rows * _LANES - B
    if pad:
        x = jnp.pad(x, (0, pad))
        y = jnp.pad(y, (0, pad))
    x2 = x.reshape(rows, _LANES)
    y2 = y.reshape(rows, _LANES)

    # ~1 MiB per input block (sized by the wider stream), sublane-aligned.
    sub = max(_sublane_multiple(x.dtype), _sublane_multiple(y.dtype))
    max_itemsize = max(jnp.dtype(x.dtype).itemsize, jnp.dtype(y.dtype).itemsize)
    tile_rows = max(sub, _TARGET_BLOCK_BYTES // (_LANES * max_itemsize))
    tile_rows = min(_round_up(tile_rows, sub), _round_up(rows, sub))

    num_tiles = pl.cdiv(rows, tile_rows)
    need_mask = (num_tiles * tile_rows * _LANES != B)

    kernel = functools.partial(
        _celoss_kernel, tile_rows=tile_rows, n_valid=B, need_mask=need_mask
    )

    partials = pl.pallas_call(
        kernel,
        out_shape=jax.ShapeDtypeStruct((num_tiles * 8, _LANES), jnp.float32),
        grid=(num_tiles,),
        in_specs=[
            pl.BlockSpec((tile_rows, _LANES), lambda i: (i, 0)),
            pl.BlockSpec((tile_rows, _LANES), lambda i: (i, 0)),
        ],
        out_specs=pl.BlockSpec((8, _LANES), lambda i: (i, 0)),
        compiler_params=pltpu.CompilerParams(
            dimension_semantics=("parallel",),  # independent per-tile partials
        ),
    )(x2, y2)

    fpcls = jnp.sum(partials) / jnp.float32(B)
    return fpcls, fpcls


def _reference(output, labels):
    # Original (unstable) formulation, for correctness checking on tame inputs.
    outs = jax.nn.sigmoid(output[:, :1].astype(jnp.float32))
    lab = labels.astype(jnp.float32).reshape(outs.shape)
    pos = lab * jnp.log(outs)
    neg = (1.0 - lab) * jnp.log(1.0 - outs)
    return -jnp.mean(pos) - jnp.mean(neg)


def _check(output, labels, atol=1e-5, rtol=1e-4):
    fpcls, fpcls2 = celoss(output, labels)
    jax.block_until_ready(fpcls)
    ref = _reference(output, labels)
    assert jnp.allclose(fpcls, ref, atol=atol, rtol=rtol), (fpcls, ref)
    assert jnp.allclose(fpcls, fpcls2)


if __name__ == "__main__":
    key = jax.random.PRNGKey(0)

    # 1) Small batch (fast path, no kernel), same shape family as the module.
    k1, k2, key = jax.random.split(key, 3)
    out_small = jax.random.normal(k1, (8, 4), dtype=jnp.float32)
    lab_small = (jax.random.uniform(k2, (8, 1)) > 0.5).astype(jnp.float32)
    _check(out_small, lab_small)

    # 2) Pallas path, B multiple of 128 (no padding, reshape is metadata-only).
    k1, k2, key = jax.random.split(key, 3)
    out_a = jax.random.normal(k1, (2048, 4), dtype=jnp.float32)
    lab_a = (jax.random.uniform(k2, (2048, 1)) > 0.5).astype(jnp.float32)
    _check(out_a, lab_a)

    # 3) Pallas path, ragged B (pad + in-kernel mask path).
    k1, k2, key = jax.random.split(key, 3)
    out_b = jax.random.normal(k1, (2500, 3), dtype=jnp.float32)
    lab_b = (jax.random.uniform(k2, (2500, 1)) > 0.5).astype(jnp.float32)
    _check(out_b, lab_b)

    # 4) Pallas path, bf16 logits (16-sublane alignment path).
    k1, k2, key = jax.random.split(key, 3)
    out_c = jax.random.normal(k1, (2048, 4), dtype=jnp.bfloat16)
    lab_c = (jax.random.uniform(k2, (2048, 1)) > 0.5).astype(jnp.float32)
    _check(out_c, lab_c, atol=1e-4, rtol=1e-3)

    print("KERNEL_OK")
</pallas_src>

<mosaic_0001>
module attributes {stable_mosaic.version = 11 : i64} {
  func.func @_celoss_kernel(%arg0: i32, %arg1: memref<16x128xf32, #tpu.memory_space<vmem>>, %arg2: memref<16x128xf32, #tpu.memory_space<vmem>>, %arg3: memref<8x128xf32, #tpu.memory_space<vmem>>) attributes {dimension_semantics = [#tpu.dimension_semantics<parallel>], iteration_bounds = array<i64: 1>, scalar_prefetch = 0 : i64, scratch_operands = 0 : i64, tpu.core_type = #tpu.core_type<tc>, window_params = [{transform_indices = @transform_0, window_bounds = array<i64: 16, 128>}, {transform_indices = @transform_1, window_bounds = array<i64: 16, 128>}, {transform_indices = @transform_2, window_bounds = array<i64: 8, 128>}]} {
    %c0 = arith.constant 0 : index
    %c0_0 = arith.constant 0 : index
    %0 = vector.load %arg1[%c0, %c0_0] : memref<16x128xf32, #tpu.memory_space<vmem>>, vector<16x128xf32>
    %c0_1 = arith.constant 0 : index
    %c0_2 = arith.constant 0 : index
    %1 = vector.load %arg2[%c0_1, %c0_2] : memref<16x128xf32, #tpu.memory_space<vmem>>, vector<16x128xf32>
    %cst = arith.constant 0.000000e+00 : f32
    %2 = vector.broadcast %cst : f32 to vector<16x128xf32>
    %3 = arith.maximumf %0, %2 : vector<16x128xf32>
    %4 = arith.mulf %0, %1 : vector<16x128xf32>
    %5 = arith.subf %3, %4 : vector<16x128xf32>
    %6 = math.absf %0 : vector<16x128xf32>
    %cst_3 = arith.constant 0.000000e+00 : f32
    %7 = vector.broadcast %cst_3 : f32 to vector<16x128xf32>
    %8 = arith.subf %7, %6 : vector<16x128xf32>
    %9 = math.exp %8 : vector<16x128xf32>
    %10 = math.log1p %9 : vector<16x128xf32>
    %11 = arith.addf %5, %10 : vector<16x128xf32>
    %12 = vector.shape_cast %11 : vector<16x128xf32> to vector<2x8x128xf32>
    %cst_4 = arith.constant dense<0.000000e+00> : vector<8x128xf32>
    %13 = vector.multi_reduction <add>, %12, %cst_4 [0] : vector<2x8x128xf32> to vector<8x128xf32>
    %c0_5 = arith.constant 0 : index
    %c0_6 = arith.constant 0 : index
    %14 = vector.load %arg3[%c0_5, %c0_6] : memref<8x128xf32, #tpu.memory_space<vmem>>, vector<8x128xf32>
    tpu.vector_store %arg3[%c0_5, %c0_6], %13 {strides = array<i32>} : memref<8x128xf32, #tpu.memory_space<vmem>>, vector<8x128xf32>,
    return
  }
  func.func @transform_0(%arg0: i32) -> (i32, i32) {
    %c0_i32 = arith.constant 0 : i32
    %c0_i32_0 = arith.constant 0 : i32
    return %arg0, %c0_i32 : i32, i32
  }
  func.func @transform_1(%arg0: i32) -> (i32, i32) {
    %c0_i32 = arith.constant 0 : i32
    %c0_i32_0 = arith.constant 0 : i32
    return %arg0, %c0_i32 : i32, i32
  }
  func.func @transform_2(%arg0: i32) -> (i32, i32) {
    %c0_i32 = arith.constant 0 : i32
    %c0_i32_0 = arith.constant 0 : i32
    return %arg0, %c0_i32 : i32, i32
  }
}

</mosaic_0001>

<bundles_post_ra>
// kernel: tpu_custom_call.1
= control target key start
LH: loop header
LB: loop body
LE: loop exit
PB: predicated region body
PF: predicated region fallthrough
CT: control target
= control target key end

     0   :  { %7 = vsyncpa [#allocation3], 0  ;;  %s237_s0 = inlined_call_operand.hbm [shape: f32[16,128], index: 0, kind: input, shape index: {}]   ;;  %s238_s1 = inlined_call_operand.hbm [shape: f32[16,128], index: 1, kind: input, shape index: {}]   ;;  %s239_s2 = inlined_call_operand.hbm [shape: f32[8,128], index: 2, kind: output, shape index: {}]  }
   0x1   :  { %8 = vsyncpa [#allocation6], 0 }
   0x2   :  { %9 = vsyncpa [#allocation4], 0  ;;  %s181_s9 = smov [#allocation2]   ;;  %s109_s13 = scalar_lea.hbm %s237_s0, 256 }
   0x3   :  { %s15_s10 = sshll.u32 %s181_s9, 4  ;;  %p110_p0 = scmp.ne.s32.totalorder %s237_s0, %s109_s13  ;;  %s16_s10 = int_to_ptr.vmem [resolvable:$true] %s15_s10 }
   0x4   :  { %p113_p1 = scmp.lt.u32.totalorder %s109_s13, %s237_s0 }
   0x6   :  { %p115_p2 = pnand %p113_p1, %p110_p0 }
   0x8   :  { %118 = shalt.err (!%p115_p2)
}
   0x9   :  { %s119_s18 = scalar_lea.vmem %s16_s10, 256  ;;  %p124_p4 = scmp.lt.s32.totalorder %s16_s10, %s16_s10 }
   0xa   :  { %p120_p3 = scmp.ne.s32.totalorder %s16_s10, %s119_s18  ;;  %p125_p5 = scmp.lt.s32.totalorder %s119_s18, %s119_s18 }
   0xc   :  { %p126_p6 = por %p125_p5, %p124_p4 }
   0xe   :  { %p127_p7 = pnand %p126_p6, %p120_p3 }
  0x10   :  { %130 = shalt.err (!%p127_p7)
}
  0x11   :  { %s182_s19 = smov 128   ;;  %s183_s20 = smov 8  }
  0x12   :  { %21 = dma.hbm_to_vmem [thread:$0]  %s237_s0, 256, %s16_s10, [#allocation3], %s182_s19, %s182_s19, %s183_s20  }
  0x13   :  { %s184_s23 = smov [#allocation5]   ;;  %s131_s27 = scalar_lea.hbm %s238_s1, 256 }
  0x14   :  { %s27_s24 = sshll.u32 %s184_s23, 4  ;;  %p132_p8 = scmp.ne.s32.totalorder %s238_s1, %s131_s27  ;;  %s28_s24 = int_to_ptr.vmem [resolvable:$true] %s27_s24 }
  0x15   :  { %p135_p9 = scmp.lt.u32.totalorder %s131_s27, %s238_s1 }
  0x17   :  { %p137_p10 = pnand %p135_p9, %p132_p8 }
  0x19   :  { %140 = shalt.err (!%p137_p10)
}
  0x1a   :  { %s141_s4 = scalar_lea.vmem %s28_s24, 256  ;;  %p146_p12 = scmp.lt.s32.totalorder %s28_s24, %s28_s24 }
  0x1b   :  { %p142_p11 = scmp.ne.s32.totalorder %s28_s24, %s141_s4  ;;  %p147_p13 = scmp.lt.s32.totalorder %s141_s4, %s141_s4 }
  0x1d   :  { %p148_p0 = por %p147_p13, %p146_p12 }
  0x1f   :  { %p149_p1 = pnand %p148_p0, %p142_p11 }
  0x21   :  { %152 = shalt.err (!%p149_p1)
}
  0x22   :  { %33 = dma.hbm_to_vmem [thread:$0]  %s238_s1, 256, %s28_s24, [#allocation6], %s182_s19, %s182_s19, %s183_s20  }
  0x23   :  { %175 = dma.done.wait [#allocation3], 256  }
  0x24   :  { %176 = vsyncadd [#allocation3], 4294967040 }
  0x25   :  { %177 = dma.done.wait [#allocation6], 256  }
  0x26   :  { %178 = vsyncadd [#allocation6], 4294967040  ;;  %v40_v0 = vld [vmem:[#allocation2] sm:$0xff]  ;;  %v41_v1 = vld [vmem:[#allocation2 + $0x8] sm:$0xff]  ;;  %s185_s1 = smov [#allocation7]  }
  0x27   :  { %v50_v2 = vand.u32 2147483647, %v40_v0  ;;  %v51_v3 = vand.u32 2147483647, %v41_v1  ;;  %v42_v14 = vld [vmem:[#allocation5] sm:$0xff]  ;;  %v43_v15 = vld [vmem:[#allocation5 + $0x8] sm:$0xff] }
  0x28   :  { %v44_v17 = vmax.f32 %v40_v0, 0.0  ;;  %v46_v18 = vmul.f32 %v42_v14, %v40_v0  ;;  %v45_v21 = vmax.f32 %v41_v1, 0.0  ;;  %v47_v22 = vmul.f32 %v43_v15, %v41_v1  ;;  %s86_s6 = sshll.u32 %s185_s1, 4  ;;  %s87_s6 = int_to_ptr.vmem [resolvable:$true] %s86_s6 }
  0x29   :  { %v52_v4 = vsub.f32 0.0, %v50_v2  ;;  %v53_v5 = vsub.f32 0.0, %v51_v3  ;;  %s153_s7 = scalar_lea.vmem %s87_s6, 128  ;;  %p158_p3 = scmp.lt.s32.totalorder %s87_s6, %s87_s6 }
  0x2a   :  { %v48_v26 = vsub.f32 %v44_v17, %v46_v18  ;;  %v49_v29 = vsub.f32 %v45_v21, %v47_v22  ;;  %p154_p2 = scmp.ne.s32.totalorder %s87_s6, %s153_s7  ;;  %p159_p4 = scmp.lt.s32.totalorder %s153_s7, %s153_s7 }
  0x2b   :  { %v54_v6 = vmul.f32 1.442695, %v52_v4  ;;  %v56_v7 = vmul.f32 1.442695, %v53_v5 }
  0x2c   :  { %p160_p5 = por %p159_p4, %p158_p3 }
  0x2d   :  { %101 = vpow2.f32 %v54_v6 }
  0x2e   :  { %103 = vpow2.f32 %v56_v7  ;;  %p161_p6 = pnand %p160_p5, %p154_p2 }
  0x37   :  { %v102_v8 = vpop.eup %101 }
  0x38   :  { %v104_v9 = vpop.eup %103  ;;  %v58_v10 = vadd.f32 1.0, %v102_v8  ;;  %v61_v12 = vmul.f32 -0.5, %v102_v8  ;;  %v64_v19 = vand.u32 2147483647, %v102_v8 }
  0x39   :  { %v67_v11 = vadd.f32 1.0, %v104_v9  ;;  %v70_v13 = vmul.f32 -0.5, %v104_v9  ;;  %v73_v23 = vand.u32 2147483647, %v104_v9 }
  0x3a   :  { %105 = vlog2.f32 %v58_v10  ;;  %v62_v16 = vadd.f32 1.0, %v61_v12  ;;  %vm65_vm0 = vcmp.lt.f32.partialorder %v64_v19, 0.0004427343 }
  0x3b   :  { %107 = vlog2.f32 %v67_v11  ;;  %v71_v20 = vadd.f32 1.0, %v70_v13  ;;  %vm74_vm1 = vcmp.lt.f32.partialorder %v73_v23, 0.0004427343 }
  0x3c   :  { %v63_v24 = vmul.f32 %v102_v8, %v62_v16 }
  0x3d   :  { %v72_v27 = vmul.f32 %v104_v9, %v71_v20 }
  0x44   :  { %v106_v25 = vpop.eup %105 }
  0x45   :  { %v108_v28 = vpop.eup %107  ;;  %v60_v30 = vmul.f32 0.6931472, %v106_v25 }
  0x46   :  { %v69_v31 = vmul.f32 0.6931472, %v108_v28 }
  0x47   :  { %v66_v32 = vsel %vm65_vm0, %v63_v24, %v60_v30 }
  0x48   :  { %v75_v33 = vsel %vm74_vm1, %v72_v27, %v69_v31  ;;  %v76_v34 = vadd.f32 %v66_v32, %v48_v26 }
  0x49   :  { %v77_v35 = vadd.f32 %v75_v33, %v49_v29 }
  0x4b   :  { %v78_v36 = vadd.f32 %v77_v35, %v76_v34 }
  0x4d   :  { %79 = vst [vmem:[#allocation7] sm:$0xff] %v78_v36 }
  0x4e   :  { %164 = shalt.err (!%p161_p6)
}
  0x4f   :  { %s165_s10 = scalar_lea.hbm %s239_s2, 128 }
  0x50   :  { %p166_p7 = scmp.ne.s32.totalorder %s239_s2, %s165_s10  ;;  %p169_p8 = scmp.lt.u32.totalorder %s165_s10, %s239_s2 }
  0x52   :  { %p171_p9 = pnand %p169_p8, %p166_p7 }
  0x54   :  { %174 = shalt.err (!%p171_p9)
}
  0x55   :  { %89 = dma.vmem_to_hbm [thread:$0]  %s87_s6, 128, %s239_s2, [#allocation4]  }
  0x56   :  { %179 = dma.done.wait [#allocation4], 128  }
  0x57   :  { %180 = vsyncadd [#allocation4], 4294967168 }
  0x58   :  { %93 = vsyncpa [#allocation3], 1 }
  0x59   :  { %94 = vsyncpa [#allocation6], 1 }
  0x5a   :  { %95 = vsyncpa [#allocation4], 1 }

</bundles_post_ra>
